<compile_context>
chip_gen: v7x
topology: tpu7x:2x2x1
jax: 0.10.0
libtpu: 0.0.40
codegen_flags: <defaults>
</compile_context>

<pallas_src>
import functools

import jax
import jax.numpy as jnp
import numpy as np
from jax.experimental import pallas as pl
from jax.experimental.pallas import tpu as pltpu


def _gelu_exact(x):
    # PyTorch nn.GELU() default = exact erf formulation.
    return 0.5 * x * (1.0 + jax.lax.erf(x * np.float32(1.0 / np.sqrt(2.0))))


def _mlp_subblock_kernel(x_ref, g_ref, beta_ref, w1_ref, b1_ref, w2_ref, b2_ref, o_ref, *, eps):
    # x_ref: (TM, dim_v) row tile of tokens (B and N collapsed in the wrapper).
    x = x_ref[...].astype(jnp.float32)

    # --- LayerNorm (f32), single pass over the lane axis: E[x], E[x^2]. ---
    inv_d = np.float32(1.0 / x.shape[-1])
    mean = jnp.sum(x, axis=-1, keepdims=True) * inv_d
    ex2 = jnp.sum(x * x, axis=-1, keepdims=True) * inv_d
    var = ex2 - mean * mean
    xn = (x - mean) * jax.lax.rsqrt(var + np.float32(eps))
    xn = xn * g_ref[...] + beta_ref[...]                               # (TM, dim_v), f32

    # --- fc1 + GELU: bf16 MXU operands, f32 accumulation. ---
    h = jnp.dot(xn.astype(jnp.bfloat16), w1_ref[...],
                preferred_element_type=jnp.float32)                    # (TM, dim_c)
    h = _gelu_exact(h + b1_ref[...])

    # --- ConvTranspose2d(k=stride=p) folded into a matmul; w2 columns ordered (ki, kj, co):
    #     y[t, ki*p*dim_c + kj*dim_c + co] = sum_ci h[t, ci] * W_ct[ci, co, ki, kj] + b_ct[co]
    y = jnp.dot(h.astype(jnp.bfloat16), w2_ref[...],
                preferred_element_type=jnp.float32) + b2_ref[...]      # (TM, dim_c*p*p)
    o_ref[...] = y.astype(o_ref.dtype)


def _round_up(a, b):
    return (a + b - 1) // b * b


def mlp_subblock_v2c(x, params, *, dim_c, patches_hw, pool, eps=1e-5, block_rows=512):
    B, N, dim_v = x.shape
    h, w = patches_hw
    assert N == h * w, "token count must equal (Hp/p)*(Wp/p)"
    gamma, beta, w1, b1, wct, bct = params
    dout = dim_c * pool * pool

    # Collapse batch & tokens into one large row matrix; pick a row tile that balances the
    # tiles and minimizes pad waste (always a multiple of 8 sublanes).
    M = B * N
    n_tiles = max(1, pl.cdiv(M, block_rows))
    tm = _round_up(pl.cdiv(M, n_tiles), 8)
    m_pad = tm * n_tiles
    x_flat = x.reshape(M, dim_v)
    if m_pad != M:
        x_flat = jnp.pad(x_flat, ((0, m_pad - M), (0, 0)))

    # Parameter prep (bf16 MXU operands; f32 biases / LN affine).
    w1_t = w1.T.astype(jnp.bfloat16)                                   # (dim_v, dim_c)
    # ConvTranspose2d weight (ci, co, ki, kj) -> (ci, (ki, kj, co)) folded matmul weight.
    w2 = jnp.transpose(wct, (0, 2, 3, 1)).reshape(dim_c, dout).astype(jnp.bfloat16)
    b2 = jnp.tile(bct, pool * pool).reshape(1, dout).astype(jnp.float32)

    grid = (n_tiles,)
    out = pl.pallas_call(
        functools.partial(_mlp_subblock_kernel, eps=eps),
        out_shape=jax.ShapeDtypeStruct((m_pad, dout), x.dtype),
        grid=grid,
        in_specs=[
            pl.BlockSpec((tm, dim_v), lambda m: (m, 0)),     # x row tile
            pl.BlockSpec((1, dim_v), lambda m: (0, 0)),      # LN gamma (resident)
            pl.BlockSpec((1, dim_v), lambda m: (0, 0)),      # LN beta  (resident)
            pl.BlockSpec((dim_v, dim_c), lambda m: (0, 0)),  # fc1 weight^T (bf16, resident)
            pl.BlockSpec((1, dim_c), lambda m: (0, 0)),      # fc1 bias (resident)
            pl.BlockSpec((dim_c, dout), lambda m: (0, 0)),   # folded convT weight (bf16, resident)
            pl.BlockSpec((1, dout), lambda m: (0, 0)),       # folded convT bias (resident)
        ],
        out_specs=pl.BlockSpec((tm, dout), lambda m: (m, 0)),
        compiler_params=pltpu.CompilerParams(dimension_semantics=("parallel",)),
    )(
        x_flat,
        gamma.reshape(1, dim_v).astype(jnp.float32),
        beta.reshape(1, dim_v).astype(jnp.float32),
        w1_t,
        b1.reshape(1, dim_c).astype(jnp.float32),
        w2,
        b2,
    )

    # Rearrange (M, (ki,kj,co)) -> (B, (h*p)*(w*p), dim_c).  With the (ki,kj,co) column order
    # this permute only moves contiguous (kj,co) granules of p*dim_c elements (tile-regular),
    # matching PyTorch's convT output .reshape(B, dim_c, -1).transpose(1, 2).
    y = out[:M].reshape(B, h, w, pool, pool, dim_c)          # (b, i, j, ki, kj, co)
    y = jnp.transpose(y, (0, 1, 3, 2, 4, 5))                 # (b, i, ki, j, kj, co)
    return y.reshape(B, h * pool * w * pool, dim_c)


def reference_jax(x, params, *, dim_c, patches_hw, pool, eps=1e-5):
    gamma, beta, w1, b1, wct, bct = params
    B, N, dim_v = x.shape
    h, w = patches_hw
    mean = x.mean(-1, keepdims=True)
    var = ((x - mean) ** 2).mean(-1, keepdims=True)
    xn = (x - mean) / jnp.sqrt(var + eps) * gamma + beta
    z = xn @ w1.T + b1
    z = 0.5 * z * (1.0 + jax.lax.erf(z / jnp.sqrt(2.0)))
    z = jnp.transpose(z, (0, 2, 1)).reshape(B, dim_c, h, w)
    # ConvTranspose2d, kernel==stride: out[b,o,i*p+ki,j*p+kj] = sum_c z[b,c,i,j]*W[c,o,ki,kj]+b[o]
    y = jnp.einsum("bchw,cokl->bohkwl", z, wct) + bct[None, :, None, None, None, None]
    y = y.reshape(B, dim_c, h * pool * w * pool)
    return jnp.transpose(y, (0, 2, 1))


if __name__ == "__main__":
    # Module hyperparameters (small, consistent with the forward's shape contract).
    dim_v = 32
    dim_c = 16
    const_patches_shape = (8, 8)
    token_pool_size = 2
    hp = const_patches_shape[0] // token_pool_size   # 4
    wp = const_patches_shape[1] // token_pool_size   # 4
    B, N = 2, hp * wp                                # N = 16

    key = jax.random.PRNGKey(0)
    kx, kg, kb, kw1, kb1, kw2, kb2 = jax.random.split(key, 7)

    x = jax.random.normal(kx, (B, N, dim_v), dtype=jnp.float32)

    # Deterministic synthetic parameters (shapes from __init__).
    gamma = 1.0 + 0.05 * jax.random.normal(kg, (dim_v,), dtype=jnp.float32)
    beta = 0.05 * jax.random.normal(kb, (dim_v,), dtype=jnp.float32)
    w1 = 0.1 * jax.random.normal(kw1, (dim_c, dim_v), dtype=jnp.float32)   # nn.Linear(dim_v, dim_c)
    b1 = 0.1 * jax.random.normal(kb1, (dim_c,), dtype=jnp.float32)
    wct = 0.1 * jax.random.normal(kw2, (dim_c, dim_c, token_pool_size, token_pool_size),
                                  dtype=jnp.float32)                       # ConvTranspose2d weight
    bct = 0.1 * jax.random.normal(kb2, (dim_c,), dtype=jnp.float32)
    params = (gamma, beta, w1, b1, wct, bct)

    out = mlp_subblock_v2c(x, params, dim_c=dim_c, patches_hw=(hp, wp), pool=token_pool_size)
    out = jax.block_until_ready(out)

    ref = reference_jax(x, params, dim_c=dim_c, patches_hw=(hp, wp), pool=token_pool_size)
    assert out.shape == (B, const_patches_shape[0] * const_patches_shape[1], dim_c)
    # bf16 MXU operands (f32 accumulation) vs. the pure-f32 reference -> relaxed tolerance.
    np.testing.assert_allclose(np.asarray(out), np.asarray(ref), rtol=2e-2, atol=2e-2)

    print("KERNEL_OK")
</pallas_src>

<mosaic_0001>
module attributes {stable_mosaic.version = 11 : i64} {
  func.func @_mlp_subblock_kernel(%arg0: i32, %arg1: memref<32x32xf32, #tpu.memory_space<vmem>>, %arg2: memref<1x32xf32, #tpu.memory_space<vmem>>, %arg3: memref<1x32xf32, #tpu.memory_space<vmem>>, %arg4: memref<32x16xbf16, #tpu.memory_space<vmem>>, %arg5: memref<1x16xf32, #tpu.memory_space<vmem>>, %arg6: memref<16x64xbf16, #tpu.memory_space<vmem>>, %arg7: memref<1x64xf32, #tpu.memory_space<vmem>>, %arg8: memref<32x64xf32, #tpu.memory_space<vmem>>) attributes {dimension_semantics = [#tpu.dimension_semantics<parallel>], iteration_bounds = array<i64: 1>, scalar_prefetch = 0 : i64, scratch_operands = 0 : i64, tpu.core_type = #tpu.core_type<tc>, window_params = [{transform_indices = @transform_0, window_bounds = array<i64: 32, 32>}, {pipeline_mode = #tpu.pipeline_mode<synchronous>, transform_indices = @transform_1, window_bounds = array<i64: 1, 32>}, {pipeline_mode = #tpu.pipeline_mode<synchronous>, transform_indices = @transform_2, window_bounds = array<i64: 1, 32>}, {pipeline_mode = #tpu.pipeline_mode<synchronous>, transform_indices = @transform_3, window_bounds = array<i64: 32, 16>}, {pipeline_mode = #tpu.pipeline_mode<synchronous>, transform_indices = @transform_4, window_bounds = array<i64: 1, 16>}, {pipeline_mode = #tpu.pipeline_mode<synchronous>, transform_indices = @transform_5, window_bounds = array<i64: 16, 64>}, {pipeline_mode = #tpu.pipeline_mode<synchronous>, transform_indices = @transform_6, window_bounds = array<i64: 1, 64>}, {transform_indices = @transform_7, window_bounds = array<i64: 32, 64>}]} {
    %c0 = arith.constant 0 : index
    %c0_0 = arith.constant 0 : index
    %0 = vector.load %arg1[%c0, %c0_0] : memref<32x32xf32, #tpu.memory_space<vmem>>, vector<32x32xf32>
    %cst = arith.constant dense<0.000000e+00> : vector<32xf32>
    %1 = vector.multi_reduction <add>, %0, %cst [1] : vector<32x32xf32> to vector<32xf32>
    %2 = vector.shape_cast %1 : vector<32xf32> to vector<32x1xf32>
    %cst_1 = arith.constant 3.125000e-02 : f32
    %3 = vector.broadcast %cst_1 : f32 to vector<32x1xf32>
    %4 = arith.mulf %2, %3 : vector<32x1xf32>
    %5 = arith.mulf %0, %0 : vector<32x32xf32>
    %cst_2 = arith.constant dense<0.000000e+00> : vector<32xf32>
    %6 = vector.multi_reduction <add>, %5, %cst_2 [1] : vector<32x32xf32> to vector<32xf32>
    %7 = vector.shape_cast %6 : vector<32xf32> to vector<32x1xf32>
    %cst_3 = arith.constant 3.125000e-02 : f32
    %8 = vector.broadcast %cst_3 : f32 to vector<32x1xf32>
    %9 = arith.mulf %7, %8 : vector<32x1xf32>
    %10 = arith.mulf %4, %4 : vector<32x1xf32>
    %11 = arith.subf %9, %10 : vector<32x1xf32>
    %12 = vector.broadcast %4 : vector<32x1xf32> to vector<32x32xf32>
    %13 = arith.subf %0, %12 : vector<32x32xf32>
    %cst_4 = arith.constant 9.99999974E-6 : f32
    %14 = vector.broadcast %cst_4 : f32 to vector<32x1xf32>
    %15 = arith.addf %11, %14 : vector<32x1xf32>
    %16 = math.rsqrt %15 : vector<32x1xf32>
    %17 = vector.broadcast %16 : vector<32x1xf32> to vector<32x32xf32>
    %18 = arith.mulf %13, %17 : vector<32x32xf32>
    %c0_5 = arith.constant 0 : index
    %c0_6 = arith.constant 0 : index
    %19 = vector.load %arg2[%c0_5, %c0_6] : memref<1x32xf32, #tpu.memory_space<vmem>>, vector<1x32xf32>
    %20 = vector.broadcast %19 : vector<1x32xf32> to vector<32x32xf32>
    %21 = arith.mulf %18, %20 : vector<32x32xf32>
    %c0_7 = arith.constant 0 : index
    %c0_8 = arith.constant 0 : index
    %22 = vector.load %arg3[%c0_7, %c0_8] : memref<1x32xf32, #tpu.memory_space<vmem>>, vector<1x32xf32>
    %23 = vector.broadcast %22 : vector<1x32xf32> to vector<32x32xf32>
    %24 = arith.addf %21, %23 : vector<32x32xf32>
    %25 = arith.truncf %24 : vector<32x32xf32> to vector<32x32xbf16>
    %c0_9 = arith.constant 0 : index
    %c0_10 = arith.constant 0 : index
    %26 = vector.load %arg4[%c0_9, %c0_10] : memref<32x16xbf16, #tpu.memory_space<vmem>>, vector<32x16xbf16>
    %cst_11 = arith.constant dense<0.000000e+00> : vector<32x16xf32>
    %27 = tpu.matmul %25, %26, %cst_11 {dimension_numbers = #tpu.dot_dimension_numbers<[1], [0], [0], [1], [0, 0, 1, 1], [], []>} : vector<32x32xbf16>, vector<32x16xbf16>, vector<32x16xf32> -> vector<32x16xf32>
    %c0_12 = arith.constant 0 : index
    %c0_13 = arith.constant 0 : index
    %28 = vector.load %arg5[%c0_12, %c0_13] : memref<1x16xf32, #tpu.memory_space<vmem>>, vector<1x16xf32>
    %29 = vector.broadcast %28 : vector<1x16xf32> to vector<32x16xf32>
    %30 = arith.addf %27, %29 : vector<32x16xf32>
    %cst_14 = arith.constant 5.000000e-01 : f32
    %31 = vector.broadcast %cst_14 : f32 to vector<32x16xf32>
    %32 = arith.mulf %31, %30 : vector<32x16xf32>
    %cst_15 = arith.constant 0.707106769 : f32
    %33 = vector.broadcast %cst_15 : f32 to vector<32x16xf32>
    %34 = arith.mulf %30, %33 : vector<32x16xf32>
    %35 = math.erf %34 : vector<32x16xf32>
    %cst_16 = arith.constant 1.000000e+00 : f32
    %36 = vector.broadcast %cst_16 : f32 to vector<32x16xf32>
    %37 = arith.addf %36, %35 : vector<32x16xf32>
    %38 = arith.mulf %32, %37 : vector<32x16xf32>
    %39 = arith.truncf %38 : vector<32x16xf32> to vector<32x16xbf16>
    %c0_17 = arith.constant 0 : index
    %c0_18 = arith.constant 0 : index
    %40 = vector.load %arg6[%c0_17, %c0_18] : memref<16x64xbf16, #tpu.memory_space<vmem>>, vector<16x64xbf16>
    %cst_19 = arith.constant dense<0.000000e+00> : vector<32x64xf32>
    %41 = tpu.matmul %39, %40, %cst_19 {dimension_numbers = #tpu.dot_dimension_numbers<[1], [0], [0], [1], [0, 0, 1, 1], [], []>} : vector<32x16xbf16>, vector<16x64xbf16>, vector<32x64xf32> -> vector<32x64xf32>
    %c0_20 = arith.constant 0 : index
    %c0_21 = arith.constant 0 : index
    %42 = vector.load %arg7[%c0_20, %c0_21] : memref<1x64xf32, #tpu.memory_space<vmem>>, vector<1x64xf32>
    %43 = vector.broadcast %42 : vector<1x64xf32> to vector<32x64xf32>
    %44 = arith.addf %41, %43 : vector<32x64xf32>
    %c0_22 = arith.constant 0 : index
    %c0_23 = arith.constant 0 : index
    %45 = vector.load %arg8[%c0_22, %c0_23] : memref<32x64xf32, #tpu.memory_space<vmem>>, vector<32x64xf32>
    tpu.vector_store %arg8[%c0_22, %c0_23], %44 {strides = array<i32>} : memref<32x64xf32, #tpu.memory_space<vmem>>, vector<32x64xf32>,
    return
  }
  func.func @transform_0(%arg0: i32) -> (i32, i32) {
    %c0_i32 = arith.constant 0 : i32
    %c0_i32_0 = arith.constant 0 : i32
    return %arg0, %c0_i32 : i32, i32
  }
  func.func @transform_1(%arg0: i32) -> (i32, i32) {
    %c0_i32 = arith.constant 0 : i32
    %c0_i32_0 = arith.constant 0 : i32
    %c0_i32_1 = arith.constant 0 : i32
    return %c0_i32, %c0_i32_0 : i32, i32
  }
  func.func @transform_2(%arg0: i32) -> (i32, i32) {
    %c0_i32 = arith.constant 0 : i32
    %c0_i32_0 = arith.constant 0 : i32
    %c0_i32_1 = arith.constant 0 : i32
    return %c0_i32, %c0_i32_0 : i32, i32
  }
  func.func @transform_3(%arg0: i32) -> (i32, i32) {
    %c0_i32 = arith.constant 0 : i32
    %c0_i32_0 = arith.constant 0 : i32
    %c0_i32_1 = arith.constant 0 : i32
    return %c0_i32, %c0_i32_0 : i32, i32
  }
  func.func @transform_4(%arg0: i32) -> (i32, i32) {
    %c0_i32 = arith.constant 0 : i32
    %c0_i32_0 = arith.constant 0 : i32
    %c0_i32_1 = arith.constant 0 : i32
    return %c0_i32, %c0_i32_0 : i32, i32
  }
  func.func @transform_5(%arg0: i32) -> (i32, i32) {
    %c0_i32 = arith.constant 0 : i32
    %c0_i32_0 = arith.constant 0 : i32
    %c0_i32_1 = arith.constant 0 : i32
    return %c0_i32, %c0_i32_0 : i32, i32
  }
  func.func @transform_6(%arg0: i32) -> (i32, i32) {
    %c0_i32 = arith.constant 0 : i32
    %c0_i32_0 = arith.constant 0 : i32
    %c0_i32_1 = arith.constant 0 : i32
    return %c0_i32, %c0_i32_0 : i32, i32
  }
  func.func @transform_7(%arg0: i32) -> (i32, i32) {
    %c0_i32 = arith.constant 0 : i32
    %c0_i32_0 = arith.constant 0 : i32
    return %arg0, %c0_i32 : i32, i32
  }
}

</mosaic_0001>

<bundles_post_ra>
// kernel: tpu_custom_call.1
= control target key start
LH: loop header
LB: loop body
LE: loop exit
PB: predicated region body
PF: predicated region fallthrough
CT: control target
= control target key end

     0   :  { %12 = vsyncpa [#allocation3], 0  ;;  %s556_s0 = inlined_call_operand.hbm [shape: f32[32,32], index: 0, kind: input, shape index: {}]   ;;  %s557_s1 = inlined_call_operand.vmem [shape: f32[1,32], index: 1, kind: input, shape index: {}]   ;;  %s558_s2 = inlined_call_operand.vmem [shape: f32[1,32], index: 2, kind: input, shape index: {}]   ;;  %s559_s3 = inlined_call_operand.vmem [shape: bf16[32,16], index: 3, kind: input, shape index: {}]   ;;  %s560_s4 = inlined_call_operand.vmem [shape: f32[1,16], index: 4, kind: input, shape index: {}]   ;;  %s561_s5 = inlined_call_operand.vmem [shape: bf16[16,64], index: 5, kind: input, shape index: {}]   ;;  %s562_s6 = inlined_call_operand.vmem [shape: f32[1,64], index: 6, kind: input, shape index: {}]   ;;  %s563_s7 = inlined_call_operand.hbm [shape: f32[32,64], index: 7, kind: output, shape index: {}]  }
   0x1   :  { %13 = vsyncpa [#allocation4], 0  ;;  %s427_s24 = smov [#allocation2]   ;;  %s379_s28 = scalar_lea.hbm %s556_s0, 512 }
   0x2   :  { %s19_s25 = sshll.u32 %s427_s24, 4  ;;  %p380_p0 = scmp.ne.s32.totalorder %s556_s0, %s379_s28  ;;  %s20_s25 = int_to_ptr.vmem [resolvable:$true] %s19_s25 }
   0x3   :  { %p383_p1 = scmp.lt.u32.totalorder %s379_s28, %s556_s0 }
   0x5   :  { %p385_p2 = pnand %p383_p1, %p380_p0 }
   0x7   :  { %388 = shalt.err (!%p385_p2)
}
   0x8   :  { %s389_s10 = scalar_lea.vmem %s20_s25, 512  ;;  %p394_p4 = scmp.lt.s32.totalorder %s20_s25, %s20_s25 }
   0x9   :  { %p390_p3 = scmp.ne.s32.totalorder %s20_s25, %s389_s10  ;;  %p395_p5 = scmp.lt.s32.totalorder %s389_s10, %s389_s10 }
   0xb   :  { %p396_p6 = por %p395_p5, %p394_p4 }
   0xd   :  { %p397_p7 = pnand %p396_p6, %p390_p3 }
   0xf   :  { %400 = shalt.err (!%p397_p7)
}
  0x10   :  { %s428_s11 = smov 128   ;;  %s429_s12 = smov 8  }
  0x11   :  { %25 = dma.hbm_to_vmem [thread:$0]  %s556_s0, 512, %s20_s25, [#allocation3], %s428_s11, %s428_s11, %s429_s12  }
  0x12   :  { %423 = dma.done.wait [#allocation3], 512  }
  0x13   :  { %424 = vsyncadd [#allocation3], 4294966784  ;;  %vm46_vm0 = vcmask 261120   ;;  %v486_v0 = vld [vmem:[#allocation2 + $0x10] sm:$0xff]  ;;  %v488_v1 = vld [vmem:[#allocation2] sm:$0xff]  ;;  %vm246_vm1 = vcmask 130048  }
  0x14   :  { %v490_v2 = vld [vmem:[#allocation2 + $0x18] sm:$0xff]  ;;  %v53_v3 = vsel %vm46_vm0, %v486_v0, 0.0  ;;  %v47_v4 = vsel %vm46_vm0, %v488_v1, 0.0  ;;  %v496_v5 = vld [vmem:[#allocation2 + $0x8] sm:$0xff]  ;;  %v63_v9 = vmul.f32 %v488_v1, %v488_v1  ;;  %v65_v13 = vmul.f32 %v486_v0, %v486_v0  ;;  %v360_v16 = vld [vmem:[%s559_s3] sm:$0xff]   ;;  %s430_s23 = smov [#allocation5]  }
  0x15   :  { %54 = vadd.xlane.f32.xlu1 %v53_v3  ;;  %48 = vadd.xlane.f32.xlu0 %v47_v4  ;;  %v56_v6 = vsel %vm46_vm0, %v490_v2, 0.0  ;;  %v50_v7 = vsel %vm46_vm0, %v496_v5, 0.0  ;;  %v64_v8 = vmul.f32 %v496_v5, %v496_v5  ;;  %v66_v12 = vmul.f32 %v490_v2, %v490_v2  ;;  %v361_v17 = vld [vmem:[%s559_s3 + $0x8] sm:$0xff]   ;;  %v324_v49 = vld [vmem:[%s557_s1] ss:$0 sm:$0xff]  ;;  %s312_s24 = sshll.u32 %s430_s23, 4  ;;  %s313_s24 = int_to_ptr.vmem [resolvable:$true] %s312_s24 }
  0x16   :  { %v67_v11 = vsel %vm46_vm0, %v63_v9, 0.0  ;;  %v73_v15 = vsel %vm46_vm0, %v65_v13, 0.0  ;;  %342 = vmatprep.subr.bf16.mxu0 %v360_v16  ;;  %v325_v53 = vld [vmem:[%s558_s2] ss:$0 sm:$0xff]  ;;  %vm302_vm2 = vcmask 523264   ;;  %s401_s25 = scalar_lea.vmem %s313_s24, 512  ;;  %p406_p9 = scmp.lt.s32.totalorder %s313_s24, %s313_s24 }
  0x17   :  { %v70_v10 = vsel %vm46_vm0, %v64_v8, 0.0  ;;  %v76_v14 = vsel %vm46_vm0, %v66_v12, 0.0  ;;  %343 = vmatpush3.bf16.msra.mxu0 %v360_v16  ;;  %p402_p8 = scmp.ne.s32.totalorder %s313_s24, %s401_s25  ;;  %p407_p10 = scmp.lt.s32.totalorder %s401_s25, %s401_s25 }
  0x18   :  { %344 = vmatprep.subr.bf16.mxu0 %v361_v17 }
  0x19   :  { %57 = vadd.xlane.f32.xlu1 %v56_v6  ;;  %51 = vadd.xlane.f32.xlu0 %v50_v7  ;;  %p408_p11 = por %p407_p10, %p406_p9 }
  0x1b   :  { %345 = vmatpush3.bf16.msra.mxu0 %v361_v17  ;;  %p409_p12 = pnand %p408_p11, %p402_p8 }
  0x1d   :  { %71 = vadd.xlane.f32.xlu1 %v70_v10  ;;  %68 = vadd.xlane.f32.xlu0 %v67_v11 }
  0x21   :  { %77 = vadd.xlane.f32.xlu1 %v76_v14  ;;  %74 = vadd.xlane.f32.xlu0 %v73_v15 }
  0xa2   :  { %v55_v18 = vpop.xlane.xlu1 %54  ;;  %v49_v19 = vpop.xlane.xlu0 %48 }
  0xa3   :  { %v59_v22 = vmul.f32 0.03125, %v49_v19  ;;  %v61_v24 = vmul.f32 0.03125, %v55_v18 }
  0xa5   :  { %v83_v28 = vmul.f32 %v59_v22, %v59_v22  ;;  %v85_v34 = vmul.f32 %v61_v24, %v61_v24  ;;  %v91_v48 = vsub.f32 %v488_v1, %v59_v22  ;;  %v93_v57 = vsub.f32 %v486_v0, %v61_v24  ;;  %v362_v0 = vld [vmem:[%s561_s5] sm:$0xff]  }
  0xa6   :  { %v58_v20 = vpop.xlane.xlu1 %57  ;;  %v52_v21 = vpop.xlane.xlu0 %51  ;;  %350 = vmatprep.subr.bf16.mxu1 %v362_v0 }
  0xa7   :  { %v60_v23 = vmul.f32 0.03125, %v52_v21  ;;  %v62_v25 = vmul.f32 0.03125, %v58_v20  ;;  %351 = vmatpush3.bf16.msra.mxu1 %v362_v0 }
  0xa9   :  { %v84_v29 = vmul.f32 %v60_v23, %v60_v23  ;;  %v86_v35 = vmul.f32 %v62_v25, %v62_v25  ;;  %v92_v46 = vsub.f32 %v496_v5, %v60_v23  ;;  %v94_v54 = vsub.f32 %v490_v2, %v62_v25  ;;  %v326_v2 = vld [vmem:[%s560_s4] ss:$0 sm:$0xff] }
  0xaa   :  { %v72_v26 = vpop.xlane.xlu1 %71  ;;  %v69_v27 = vpop.xlane.xlu0 %68 }
  0xab   :  { %v80_v30 = vmul.f32 0.03125, %v72_v26  ;;  %v79_v31 = vmul.f32 0.03125, %v69_v27 }
  0xad   :  { %v88_v32 = vsub.f32 %v80_v30, %v84_v29  ;;  %v87_v33 = vsub.f32 %v79_v31, %v83_v28 }
  0xae   :  { %v78_v36 = vpop.xlane.xlu1 %77  ;;  %v75_v37 = vpop.xlane.xlu0 %74 }
  0xaf   :  { %v96_v38 = vadd.f32 1e-05, %v88_v32  ;;  %v95_v39 = vadd.f32 1e-05, %v87_v33  ;;  %v82_v40 = vmul.f32 0.03125, %v78_v36  ;;  %v81_v41 = vmul.f32 0.03125, %v75_v37 }
  0xb1   :  { %363 = vrsqrt.f32 %v96_v38  ;;  %v90_v42 = vsub.f32 %v82_v40, %v86_v35  ;;  %v89_v43 = vsub.f32 %v81_v41, %v85_v34  ;;  %v331_v38 = vld [vmem:[%s562_s6] ss:$0 sm:$0xff] }
  0xb2   :  { %365 = vrsqrt.f32 %v95_v39 }
  0xb3   :  { %v98_v44 = vadd.f32 1e-05, %v90_v42  ;;  %v97_v45 = vadd.f32 1e-05, %v89_v43 }
  0xb5   :  { %367 = vrsqrt.f32 %v98_v44 }
  0xb6   :  { %369 = vrsqrt.f32 %v97_v45 }
  0xbb   :  { %v364_v47 = vpop.eup %363 }
  0xbc   :  { %v366_v50 = vpop.eup %365  ;;  %v104_v51 = vmul.f32 %v364_v47, %v92_v46 }
  0xbd   :  { %v103_v52 = vmul.f32 %v366_v50, %v91_v48 }
  0xbe   :  { %v115_v55 = vmul.f32 %v324_v49, %v104_v51 }
  0xbf   :  { %v368_v56 = vpop.eup %367  ;;  %v114_v58 = vmul.f32 %v324_v49, %v103_v52 }
  0xc0   :  { %v370_v59 = vpop.eup %369  ;;  %v126_v60 = vadd.f32 %v325_v53, %v115_v55  ;;  %v106_v61 = vmul.f32 %v368_v56, %v94_v54 }
  0xc1   :  { %v125_v62 = vadd.f32 %v325_v53, %v114_v58  ;;  %v105_v63 = vmul.f32 %v370_v59, %v93_v57 }
  0xc2   :  { %v117_v1 = vmul.f32 %v324_v49, %v106_v61 }
  0xc3   :  { %v129_v3 = vpack.c.bf16 %v126_v60, %v125_v62  ;;  %v116_v4 = vmul.f32 %v324_v49, %v105_v63 }
  0xc4   :  { %v128_v5 = vadd.f32 %v325_v53, %v117_v1 }
  0xc5   :  { %346 = vmatprep.mubr.msk.bf16.mxu0 %vm46_vm0, %v129_v3  ;;  %v127_v6 = vadd.f32 %v325_v53, %v116_v4 }
  0xc7   :  { %v130_v7 = vpack.c.bf16 %v128_v5, %v127_v6 }
  0xc9   :  { %347 = vmatmul.mubr.msk.bf16.vlgmr.msra.gmra.mrb[0].mxu0 %vm46_vm0, %v130_v7 }
 0x19c   :  { %v348_v8 = vpop.f32.mrb[0].mxu0 }
 0x19d   :  { %v203_v9 = vadd.f32 %v348_v8, %v326_v2  ;;  %v194_v10 = vpop.f32.mrb[1].mxu0 }
 0x19e   :  { %v195_v11 = vadd.f32 %v326_v2, %v194_v10  ;;  %v349_v12 = vpop.f32.mrb[2].mxu0 }
 0x19f   :  { %v215_v13 = vmul.f32 0.70710677, %v203_v9  ;;  %v206_v14 = vadd.f32 %v349_v12, %v326_v2  ;;  %v197_v15 = vpop.f32.mrb[3].mxu0  ;;  %v211_v26 = vmul.f32 0.5, %v203_v9 }
 0x1a0   :  { %v213_v16 = vmul.f32 0.70710677, %v195_v11  ;;  %v198_v17 = vadd.f32 %v326_v2, %v197_v15  ;;  %v209_v29 = vmul.f32 0.5, %v195_v11 }
 0x1a1   :  { %371 = verf.f32 %v215_v13  ;;  %v216_v18 = vmul.f32 0.70710677, %v206_v14  ;;  %v212_v27 = vmul.f32 0.5, %v206_v14 }
 0x1a2   :  { %373 = verf.f32 %v213_v16  ;;  %v214_v19 = vmul.f32 0.70710677, %v198_v17  ;;  %v210_v30 = vmul.f32 0.5, %v198_v17 }
 0x1a3   :  { %375 = verf.f32 %v216_v18 }
 0x1a4   :  { %377 = verf.f32 %v214_v19 }
 0x1ab   :  { %v372_v20 = vpop.eup %371 }
 0x1ac   :  { %v374_v21 = vpop.eup %373  ;;  %v223_v22 = vadd.f32 1.0, %v372_v20 }
 0x1ad   :  { %v376_v23 = vpop.eup %375  ;;  %v221_v24 = vadd.f32 1.0, %v374_v21 }
 0x1ae   :  { %v378_v25 = vpop.eup %377  ;;  %v224_v28 = vadd.f32 1.0, %v376_v23  ;;  %v227_v32 = vmul.f32 %v223_v22, %v211_v26 }
 0x1af   :  { %v222_v31 = vadd.f32 1.0, %v378_v25  ;;  %v225_v34 = vmul.f32 %v221_v24, %v209_v29 }
 0x1b0   :  { %v228_v33 = vmul.f32 %v224_v28, %v212_v27 }
 0x1b1   :  { %v226_v35 = vmul.f32 %v222_v31, %v210_v30 }
 0x1b2   :  { %v230_v36 = vpack.c.bf16 %v228_v33, %v227_v32 }
 0x1b3   :  { %v229_v37 = vpack.c.bf16 %v226_v35, %v225_v34 }
 0x1b5   :  { %352 = vmatprep.mubr.msk.bf16.mxu1 %vm246_vm1, %v229_v37 }
 0x1b6   :  { %353 = vmatmul.mubr.msk.bf16.vlgmr.msra.gmra.mrb[0].mxu1 %vm246_vm1, %v230_v36 }
 0x289   :  { %v354_v39 = vpop.f32.mrb[0].mxu1 }
 0x28a   :  { %v296_v40 = vadd.f32 %v354_v39, %v331_v38  ;;  %v287_v41 = vpop.f32.mrb[1].mxu1 }
 0x28b   :  { %v288_v42 = vadd.f32 %v331_v38, %v287_v41  ;;  %v355_v43 = vpop.f32.mrb[2].mxu1 }
 0x28c   :  { %305 = vst.msk [vmem:[#allocation5 + $0x10] sm:$0xff] %vm302_vm2, %v296_v40  ;;  %v299_v44 = vadd.f32 %v355_v43, %v331_v38  ;;  %v290_v45 = vpop.f32.mrb[3].mxu1 }
 0x28d   :  { %303 = vst.msk [vmem:[#allocation5] sm:$0xff] %vm302_vm2, %v288_v42  ;;  %v291_v46 = vadd.f32 %v331_v38, %v290_v45 }
 0x28e   :  { %306 = vst.msk [vmem:[#allocation5 + $0x18] sm:$0xff] %vm302_vm2, %v299_v44 }
 0x28f   :  { %304 = vst.msk [vmem:[#allocation5 + $0x8] sm:$0xff] %vm302_vm2, %v291_v46 }
 0x290   :  { %412 = shalt.err (!%p409_p12)
}
 0x291   :  { %s413_s27 = scalar_lea.hbm %s563_s7, 512 }
 0x292   :  { %p414_p13 = scmp.ne.s32.totalorder %s563_s7, %s413_s27  ;;  %p417_p0 = scmp.lt.u32.totalorder %s413_s27, %s563_s7 }
 0x294   :  { %p419_p1 = pnand %p417_p0, %p414_p13 }
 0x296   :  { %422 = shalt.err (!%p419_p1)
}
 0x297   :  { %318 = dma.vmem_to_hbm [thread:$0]  %s313_s24, 512, %s563_s7, [#allocation4], %s428_s11, %s428_s11, %s429_s12  }
 0x298   :  { %425 = dma.done.wait [#allocation4], 512  }
 0x299   :  { %426 = vsyncadd [#allocation4], 4294966784 }
 0x29a   :  { %322 = vsyncpa [#allocation3], 1 }
 0x29b   :  { %323 = vsyncpa [#allocation4], 1 }

</bundles_post_ra>
